<compile_context>
chip_gen: v7x
topology: tpu7x:2x2x1
jax: 0.10.0
libtpu: 0.0.40
codegen_flags: <defaults>
</compile_context>

<pallas_src>
import jax
import jax.numpy as jnp
from jax import lax
from jax.experimental import pallas as pl
from jax.experimental.pallas import tpu as pltpu


def _volconv_kernel(v1_ref, v2e_ref, o_ref):
    # v1_ref : (L, L, BC, L)    layout (x, y, c, z)      -- unpadded volume1
    # v2e_ref: (L, L, BC, 3L)   layout (x, y, c, z_ext)  -- [v2 | 0 | v2] along z
    # o_ref  : (1, 2L, BC, 2L)  layout (tx, ty, c, tz)   -- output slab for this tx
    L = v1_ref.shape[0]
    BC = v1_ref.shape[2]
    N = 2 * L

    tx = pl.program_id(0)
    # Overlap range along x for displacement tx:
    #   tx <  L : x in [0, L - tx),   paired v2 index x2 = x + tx
    #   tx == L : empty (that output plane is identically zero)
    #   tx >  L : x in [2L - tx, L),  paired v2 index x2 = x + tx - 2L
    lo_x = tx < L
    nx = jnp.where(lo_x, L - tx, tx - L)
    x0 = jnp.where(lo_x, 0, N - tx)
    xb0 = jnp.where(lo_x, tx, 0)

    @pl.loop(0, N)
    def _(ty):
        # Same overlap bookkeeping along y for this ty.
        lo_y = ty < L
        ny = jnp.where(lo_y, L - ty, ty - L)
        y0 = jnp.where(lo_y, 0, N - ty)
        yb0 = jnp.where(lo_y, ty, 0)

        def x_body(i, acc_x):
            x = x0 + i
            xb = xb0 + i

            def y_body(j, acc):
                y = y0 + j
                yb = yb0 + j
                a = v1_ref[x, y, :, :]      # (BC, L)   v1[c, x, y, z]
                b = v2e_ref[xb, yb, :, :]   # (BC, 3L)  z-extended v2[c, xb, yb, :]
                # acc[c, tz] += sum_z a[c, z] * b[c, z + tz]   (static windows)
                for z in range(L):
                    acc = acc + a[:, z:z + 1] * b[:, z:z + N]
                return acc

            return lax.fori_loop(0, ny, y_body, acc_x)

        row = lax.fori_loop(0, nx, x_body, jnp.zeros((BC, N), jnp.float32))
        o_ref[0, ty, :, :] = row


def volume_convolution(input_volume1, input_volume2):
    """Forward of VolumeConvolution: (B,F,L,L,L) x (B,F,L,L,L) -> (B,F,2L,2L,2L)."""
    assert input_volume1.shape == input_volume2.shape and input_volume1.ndim == 5
    B, F_, L = input_volume1.shape[0], input_volume1.shape[1], input_volume1.shape[2]
    assert input_volume1.shape[3] == L and input_volume1.shape[4] == L
    N = 2 * L
    BC = B * F_

    v1 = input_volume1.astype(jnp.float32).reshape(BC, L, L, L)
    v2 = input_volume2.astype(jnp.float32).reshape(BC, L, L, L)

    # Extend v2 along z only: [v2 | 0 | v2]  (3x; replaces the old 27x `w`).
    v2e = jnp.concatenate([v2, jnp.zeros_like(v2), v2], axis=3)   # (BC, L, L, 3L)

    # Kernel layout (x, y, c, z): channels on sublanes, z on lanes.
    v1_l = jnp.transpose(v1, (1, 2, 0, 3))      # (L, L, BC, L)
    v2e_l = jnp.transpose(v2e, (1, 2, 0, 3))    # (L, L, BC, 3L)

    # Grid-invariant inputs are double-buffered by the pipeline; only raise the
    # scoped-VMEM limit when the residency actually needs it.
    resident_bytes = 2 * 4 * (v1_l.size + v2e_l.size) + 2 * 4 * (N * BC * N)
    compiler_kwargs = dict(dimension_semantics=("parallel",))
    if resident_bytes > 28 * 1024 * 1024:
        compiler_kwargs["vmem_limit_bytes"] = int(
            min(resident_bytes + 8 * 1024 * 1024, 120 * 1024 * 1024))

    out_l = pl.pallas_call(
        _volconv_kernel,
        out_shape=jax.ShapeDtypeStruct((N, N, BC, N), jnp.float32),
        grid_spec=pltpu.PrefetchScalarGridSpec(
            num_scalar_prefetch=0,
            grid=(N,),  # tx displacements
            in_specs=[
                pl.BlockSpec((L, L, BC, L), lambda tx: (0, 0, 0, 0)),
                pl.BlockSpec((L, L, BC, 3 * L), lambda tx: (0, 0, 0, 0)),
            ],
            out_specs=pl.BlockSpec((1, N, BC, N), lambda tx: (tx, 0, 0, 0)),
        ),
        compiler_params=pltpu.CompilerParams(**compiler_kwargs),
    )(v1_l, v2e_l)

    # (tx, ty, c, tz) -> (B, F, tx, ty, tz)
    out = jnp.transpose(out_l, (2, 0, 1, 3)).reshape(B, F_, N, N, N)
    return out


if __name__ == "__main__":
    import numpy as np

    B, F_, L = 2, 4, 4                       # small shapes: batch=2, features=4, volume_size=4
    key = jax.random.PRNGKey(0)
    k1, k2 = jax.random.split(key)
    v1 = jax.random.normal(k1, (B, F_, L, L, L), dtype=jnp.float32)
    v2 = jax.random.normal(k2, (B, F_, L, L, L), dtype=jnp.float32)

    out = jax.jit(volume_convolution)(v1, v2)
    out = jax.block_until_ready(out)

    # Reference: circular cross-correlation of zero-padded volumes via numpy FFT
    # (exactly what the CUDA cuFFT implementation computes).
    N = 2 * L
    v1p = np.zeros((B, F_, N, N, N), np.float32); v1p[:, :, :L, :L, :L] = np.asarray(v1)
    v2p = np.zeros((B, F_, N, N, N), np.float32); v2p[:, :, :L, :L, :L] = np.asarray(v2)
    F1 = np.fft.fftn(v1p, axes=(2, 3, 4))
    F2 = np.fft.fftn(v2p, axes=(2, 3, 4))
    ref = np.real(np.fft.ifftn(np.conj(F1) * F2, axes=(2, 3, 4))).astype(np.float32)

    assert out.shape == (B, F_, N, N, N) and out.dtype == jnp.float32
    np.testing.assert_allclose(np.asarray(out), ref, rtol=1e-4, atol=1e-4)
    print("KERNEL_OK")
</pallas_src>

<mosaic_0001>
module attributes {stable_mosaic.version = 11 : i64} {
  func.func @_volconv_kernel(%arg0: i32, %arg1: memref<4x4x8x4xf32, #tpu.memory_space<vmem>>, %arg2: memref<4x4x8x12xf32, #tpu.memory_space<vmem>>, %arg3: memref<1x8x8x8xf32, #tpu.memory_space<vmem>>) attributes {dimension_semantics = [#tpu.dimension_semantics<parallel>], iteration_bounds = array<i64: 8>, scalar_prefetch = 0 : i64, scratch_operands = 0 : i64, tpu.core_type = #tpu.core_type<tc>, window_params = [{pipeline_mode = #tpu.pipeline_mode<synchronous>, transform_indices = @transform_0, window_bounds = array<i64: 4, 4, 8, 4>}, {pipeline_mode = #tpu.pipeline_mode<synchronous>, transform_indices = @transform_1, window_bounds = array<i64: 4, 4, 8, 12>}, {transform_indices = @transform_2, window_bounds = array<i64: 1, 8, 8, 8>}]} {
    %c4_i32 = arith.constant 4 : i32
    %0 = arith.cmpi slt, %arg0, %c4_i32 : i32
    %c4_i32_0 = arith.constant 4 : i32
    %1 = arith.subi %c4_i32_0, %arg0 : i32
    %c4_i32_1 = arith.constant 4 : i32
    %2 = arith.subi %arg0, %c4_i32_1 : i32
    %3 = arith.select %0, %1, %2 : i32
    %c8_i32 = arith.constant 8 : i32
    %4 = arith.subi %c8_i32, %arg0 : i32
    %c0_i32 = arith.constant 0 : i32
    %5 = arith.select %0, %c0_i32, %4 : i32
    %c0_i32_2 = arith.constant 0 : i32
    %6 = arith.select %0, %arg0, %c0_i32_2 : i32
    %c0_i32_3 = arith.constant 0 : i32
    %c8_i32_4 = arith.constant 8 : i32
    %7 = arith.addi %c0_i32_3, %c8_i32_4 : i32
    %c1_i32 = arith.constant 1 : i32
    scf.for %arg4 = %c0_i32_3 to %7 step %c1_i32  : i32 {
      %c1_i32_6 = arith.constant 1 : i32
      %8 = arith.muli %arg4, %c1_i32_6 : i32
      %c0_i32_7 = arith.constant 0 : i32
      %9 = arith.addi %c0_i32_7, %8 : i32
      %c4_i32_8 = arith.constant 4 : i32
      %10 = arith.cmpi slt, %9, %c4_i32_8 : i32
      %c4_i32_9 = arith.constant 4 : i32
      %11 = arith.subi %c4_i32_9, %9 : i32
      %c4_i32_10 = arith.constant 4 : i32
      %12 = arith.subi %9, %c4_i32_10 : i32
      %13 = arith.select %10, %11, %12 : i32
      %c8_i32_11 = arith.constant 8 : i32
      %14 = arith.subi %c8_i32_11, %9 : i32
      %c0_i32_12 = arith.constant 0 : i32
      %15 = arith.select %10, %c0_i32_12, %14 : i32
      %c0_i32_13 = arith.constant 0 : i32
      %16 = arith.select %10, %9, %c0_i32_13 : i32
      %cst = arith.constant 0.000000e+00 : f32
      %17 = vector.broadcast %cst : f32 to vector<8x8xf32>
      %c0_i32_14 = arith.constant 0 : i32
      %18 = arith.subi %3, %c0_i32_14 : i32
      %19 = arith.addi %c0_i32_14, %18 : i32
      %c1_i32_15 = arith.constant 1 : i32
      %20 = scf.for %arg5 = %c0_i32_14 to %19 step %c1_i32_15 iter_args(%arg6 = %17) -> (vector<8x8xf32>)  : i32 {
        %25 = arith.addi %5, %arg5 : i32
        %26 = arith.addi %6, %arg5 : i32
        %c0_i32_18 = arith.constant 0 : i32
        %27 = arith.subi %13, %c0_i32_18 : i32
        %28 = arith.addi %c0_i32_18, %27 : i32
        %c1_i32_19 = arith.constant 1 : i32
        %29 = scf.for %arg7 = %c0_i32_18 to %28 step %c1_i32_19 iter_args(%arg8 = %arg6) -> (vector<8x8xf32>)  : i32 {
          %30 = arith.addi %15, %arg7 : i32
          %31 = arith.addi %16, %arg7 : i32
          %32 = arith.index_cast %25 : i32 to index
          %33 = arith.index_cast %30 : i32 to index
          %c0_20 = arith.constant 0 : index
          %c0_21 = arith.constant 0 : index
          %34 = vector.load %arg1[%32, %33, %c0_20, %c0_21] : memref<4x4x8x4xf32, #tpu.memory_space<vmem>>, vector<1x1x8x4xf32>
          %35 = vector.shape_cast %34 : vector<1x1x8x4xf32> to vector<8x4xf32>
          %36 = arith.index_cast %26 : i32 to index
          %37 = arith.index_cast %31 : i32 to index
          %c0_22 = arith.constant 0 : index
          %c0_23 = arith.constant 0 : index
          %38 = vector.load %arg2[%36, %37, %c0_22, %c0_23] : memref<4x4x8x12xf32, #tpu.memory_space<vmem>>, vector<1x1x8x12xf32>
          %39 = vector.shape_cast %38 : vector<1x1x8x12xf32> to vector<8x12xf32>
          %40 = vector.extract_strided_slice %35 {offsets = [0, 0], sizes = [8, 1], strides = [1, 1]} : vector<8x4xf32> to vector<8x1xf32>
          %41 = vector.extract_strided_slice %39 {offsets = [0, 0], sizes = [8, 8], strides = [1, 1]} : vector<8x12xf32> to vector<8x8xf32>
          %42 = vector.broadcast %40 : vector<8x1xf32> to vector<8x8xf32>
          %43 = arith.mulf %42, %41 : vector<8x8xf32>
          %44 = arith.addf %arg8, %43 : vector<8x8xf32>
          %45 = vector.extract_strided_slice %35 {offsets = [0, 1], sizes = [8, 1], strides = [1, 1]} : vector<8x4xf32> to vector<8x1xf32>
          %46 = vector.extract_strided_slice %39 {offsets = [0, 1], sizes = [8, 8], strides = [1, 1]} : vector<8x12xf32> to vector<8x8xf32>
          %47 = vector.broadcast %45 : vector<8x1xf32> to vector<8x8xf32>
          %48 = arith.mulf %47, %46 : vector<8x8xf32>
          %49 = arith.addf %44, %48 : vector<8x8xf32>
          %50 = vector.extract_strided_slice %35 {offsets = [0, 2], sizes = [8, 1], strides = [1, 1]} : vector<8x4xf32> to vector<8x1xf32>
          %51 = vector.extract_strided_slice %39 {offsets = [0, 2], sizes = [8, 8], strides = [1, 1]} : vector<8x12xf32> to vector<8x8xf32>
          %52 = vector.broadcast %50 : vector<8x1xf32> to vector<8x8xf32>
          %53 = arith.mulf %52, %51 : vector<8x8xf32>
          %54 = arith.addf %49, %53 : vector<8x8xf32>
          %55 = vector.extract_strided_slice %35 {offsets = [0, 3], sizes = [8, 1], strides = [1, 1]} : vector<8x4xf32> to vector<8x1xf32>
          %56 = vector.extract_strided_slice %39 {offsets = [0, 3], sizes = [8, 8], strides = [1, 1]} : vector<8x12xf32> to vector<8x8xf32>
          %57 = vector.broadcast %55 : vector<8x1xf32> to vector<8x8xf32>
          %58 = arith.mulf %57, %56 : vector<8x8xf32>
          %59 = arith.addf %54, %58 : vector<8x8xf32>
          scf.yield %59 : vector<8x8xf32>
        }
        scf.yield %29 : vector<8x8xf32>
      }
      %c0 = arith.constant 0 : index
      %21 = arith.index_cast %9 : i32 to index
      %c0_16 = arith.constant 0 : index
      %c0_17 = arith.constant 0 : index
      %22 = vector.load %arg3[%c0, %21, %c0_16, %c0_17] : memref<1x8x8x8xf32, #tpu.memory_space<vmem>>, vector<1x1x8x8xf32>
      %23 = vector.shape_cast %22 : vector<1x1x8x8xf32> to vector<8x8xf32>
      %24 = vector.shape_cast %20 : vector<8x8xf32> to vector<1x1x8x8xf32>
      tpu.vector_store %arg3[%c0, %21, %c0_16, %c0_17], %24 {strides = array<i32>} : memref<1x8x8x8xf32, #tpu.memory_space<vmem>>, vector<1x1x8x8xf32>,
    }
    %c8_i32_5 = arith.constant 8 : i32
    return
  }
  func.func @transform_0(%arg0: i32) -> (i32, i32, i32, i32) {
    %c0_i32 = arith.constant 0 : i32
    %c0_i32_0 = arith.constant 0 : i32
    %c0_i32_1 = arith.constant 0 : i32
    %c0_i32_2 = arith.constant 0 : i32
    %c0_i32_3 = arith.constant 0 : i32
    return %c0_i32, %c0_i32_0, %c0_i32_1, %c0_i32_2 : i32, i32, i32, i32
  }
  func.func @transform_1(%arg0: i32) -> (i32, i32, i32, i32) {
    %c0_i32 = arith.constant 0 : i32
    %c0_i32_0 = arith.constant 0 : i32
    %c0_i32_1 = arith.constant 0 : i32
    %c0_i32_2 = arith.constant 0 : i32
    %c0_i32_3 = arith.constant 0 : i32
    return %c0_i32, %c0_i32_0, %c0_i32_1, %c0_i32_2 : i32, i32, i32, i32
  }
  func.func @transform_2(%arg0: i32) -> (i32, i32, i32, i32) {
    %c0_i32 = arith.constant 0 : i32
    %c0_i32_0 = arith.constant 0 : i32
    %c0_i32_1 = arith.constant 0 : i32
    %c0_i32_2 = arith.constant 0 : i32
    return %arg0, %c0_i32, %c0_i32_0, %c0_i32_1 : i32, i32, i32, i32
  }
}

</mosaic_0001>

<bundles_post_ra>
// kernel: volume_convolution.1
= control target key start
LH: loop header
LB: loop body
LE: loop exit
PB: predicated region body
PF: predicated region fallthrough
CT: control target
= control target key end

     0   :  { %s471_s9 = smov 0   ;;  %s564_s0 = inlined_call_operand.vmem [shape: f32[4,4,8,4], index: 0, kind: input, shape index: {}]   ;;  %s565_s1 = inlined_call_operand.vmem [shape: f32[4,4,8,12], index: 1, kind: input, shape index: {}]   ;;  %s566_s2 = inlined_call_operand.vmem [shape: f32[8,8,8,8], index: 2, kind: output, shape index: {}]  }
   0x1 LB: > { %s291_s10 = sadd.s32 4294967295, %s419_s9   ;;  %p294_p0 = scmp.ge.s32.totalorder %s419_s9, 1  ;;  %s419_s9 = sphi %s471_s9, %s12_s9  }
   0x2   : > { %p102_p1 = scmp.lt.s32.totalorder %s419_s9, 9 }
   0x4   : > { %p103_p2 = pnand %p294_p0, %p102_p1 }
   0x5   : > { %p119_p3 = scmp.lt.s32.totalorder (!%p103_p2), %s291_s10, 7  ;;  %p124_p4 = scmp.lt.s32.totalorder (!%p103_p2), %s291_s10, 4 }
   0x6   : > { %106 = sbr.rel (%p103_p2) target bundleno = 320 (0x140), region = 28  ;;  %s125_s11 = ssub.s32 (!%p103_p2), 4, %s291_s10 }
   0x7   : > { %s297_s12 = sadd.s32 (!%p103_p2), 4294967292, %s291_s10  ;;  %s128_s15 = ssub.s32 (!%p103_p2), 8, %s291_s10 }
   0x8   : > { %s490_s19 = smov (!%p103_p2), 0  }
   0xd   : > { %s120_s13 = scalar_select %p119_p3, %s291_s10, 7 }
   0xe   : > { %s570_s11 = smov (!%p124_p4, %s125_s11), %s297_s12  ;;  %s572_s15 = smov (%p124_p4, %s128_s15), 0 }
   0xf   : > { %s308_s14 = sshll.u32 %s120_s13, 6  ;;  %s574_s10 = smov (!%p124_p4, %s291_s10), 0 }
  0x10   : > { %s484_s18 = scalar_lea.vmem %s566_s2, %s308_s14 }
  0x11 LB: >> { %p137_p5 = scmp.lt.s32.totalorder %s423_s19, 4  ;;  %s138_s20 = ssub.s32 4, %s423_s19  ;;  %v507_v0 = vmov 0.0   ;;  %s423_s19 = sphi %s490_s19, %s136_s19  }
  0x12   : >> { %s298_s21 = sadd.s32 4294967292, %s423_s19  ;;  %s141_s22 = ssub.s32 8, %s423_s19 }
  0x13   : >> { %s576_s20 = smov (!%p137_p5, %s138_s20), %s298_s21  ;;  %s578_s22 = smov (%p137_p5, %s141_s22), 0 }
  0x14   : >> { %s504_s23 = scalar_select %p137_p5, %s423_s19, 0 }
  0x15   : >> { %p299_p6 = scmp.le.s32.totalorder %s570_s11, 0 }
  0x16   : >> { %v509_v1 = vmov (!%p299_p6), 0.0   ;;  %s511_s24 = smov (!%p299_p6), 0  }
  0x17   : >> { %267 = sbr.rel (%p299_p6) target bundleno = 310 (0x136), region = 84 }
  0x1e LB: >>> { %s151_s25 = sadd.s32 %s431_s24, %s572_s15  ;;  %s152_s26 = sadd.s32 %s431_s24, %s574_s10  ;;  %v441_v2 = vmov %v427_v1   ;;  %s431_s24 = sphi %s511_s24, %s147_s24   ;;  %v427_v1 = vphi %v509_v1, %v567_v1  }
  0x1f   : >>> { %p300_p7 = scmp.le.s32.totalorder %s576_s20, 0 }
  0x20   : >>> { %v433_v3 = vmov (!%p300_p7), %v427_v1   ;;  %s522_s27 = smov (!%p300_p7), 0  }
  0x21   : >>> { %259 = sbr.rel (%p300_p7) target bundleno = 300 (0x12c), region = 73 }
  0x28 LB: >>>> { %v449_v4 = vmov 1   ;;  %s302_s28 = sshll.u32 %s151_s25, 5  ;;  %v450_v5 = vmov 3   ;;  %s160_s29 = sadd.s32 %s439_s27, %s578_s22  ;;  %v451_v7 = vmov 2   ;;  %v452_v8 = vmov 0   ;;  %s439_s27 = sphi %s522_s27, %s156_s27   ;;  %v435_v3 = vphi %v433_v3, %v434_v3  }
  0x29   : >>>> { %380 = vset.pattern.permute.xlu0 %v449_v4  ;;  %382 = vset.pattern.permute.xlu1 %v450_v5  ;;  %s301_s30 = sshll.u32 %s160_s29, 3  ;;  %s161_s7 = sadd.s32 %s439_s27, %s504_s23 }
  0x2a   : >>>> { %s164_s3 = sadd.s32 %s302_s28, %s301_s30  ;;  %s303_s8 = sshll.u32 %s161_s7, 3 }
  0x2b   : >>>> { %s165_s6 = scalar_lea.vmem %s564_s0, %s164_s3  ;;  %s304_s12 = sshll.u32 %s152_s26, 5 }
  0x2c   : >>>> { %v166_v6 = vld [vmem:[%s165_s6] sm:$0xff]  ;;  %s169_s13 = sadd.s32 %s304_s12, %s303_s8  ;;  %s453_s21 = smov 127  }
  0x2d   : >>>> { %180 = vperm.xlu0 %380, %v166_v6   ;;  %200 = vperm.xlu1 %382, %v166_v6   ;;  %s170_s17 = scalar_lea.vmem %s565_s1, %s169_s13  ;;  %s454_s28 = smov 125  }
  0x2e   : >>>> { %v171_v9 = vld [vmem:[%s170_s17] sm:$0xff]  ;;  %s455_s29 = smov 126   ;;  %s156_s27 = sadd.s32 1, %s439_s27  }
  0x2f   : >>>> { %p155_p8 = scmp.ge.s32.totalorder %s156_s27, %s576_s20 }
  0x31   : >>>> { %381 = vset.pattern.permute.xlu0 %v451_v7  ;;  %383 = vset.pattern.permute.xlu1 %v452_v8 }
  0x32   : >>>> { %190 = vperm.xlu0 %381, %v166_v6   ;;  %174 = vperm.xlu1 %383, %v166_v6  }
  0x36   : >>>> { %384 = vset.pattern.permute.xlu0 %v450_v5 }
  0xac   : >>>> { %v181_v10 = vpop.permute.xlu0 %180  ;;  %v201_v11 = vpop.permute.xlu1 %200 }
  0xad   : >>>> { %v183_v12 = vmul.f32 %v181_v10, %v171_v9  ;;  %v203_v13 = vmul.f32 %v201_v11, %v171_v9 }
  0xaf   : >>>> { %185 = vrot.lane.b32.xlu1 %v183_v12, %s453_s21 }
  0xb1   : >>>> { %v191_v14 = vpop.permute.xlu0 %190  ;;  %v175_v16 = vpop.permute.xlu1 %174 }
  0xb2   : >>>> { %v193_v15 = vmul.f32 %v191_v14, %v171_v9  ;;  %v177_v17 = vmul.f32 %v175_v16, %v171_v9 }
  0xb3   : >>>> { %205 = vrot.lane.b32.xlu1 %v203_v13, %s454_s28 }
  0xb4   : >>>> { %195 = vrot.lane.b32.xlu0 %v193_v15, %s455_s29  ;;  %v178_v18 = vadd.f32 %v435_v3, %v177_v17 }
 0x121   : >>>> { %v186_v19 = vpop.permute.xlu1 %185 }
 0x122   : >>>> { %v188_v20 = vadd.f32 %v186_v19, %v178_v18 }
 0x125   : >>>> { %v206_v22 = vpop.permute.xlu1 %205  ;;  %158 = sbr.rel (!%p155_p8) target bundleno = 40 (0x28), region = 79 }
 0x126   : >>>> { %v196_v21 = vpop.permute.xlu0 %195 }
 0x127   : >>>> { %v198_v23 = vadd.f32 %v196_v21, %v188_v20 }
 0x129   : >>>> { %v208_v24 = vadd.f32 %v206_v22, %v198_v23  }
 0x12b   : >>>> { %v434_v3 = vmov %v208_v24   ;;  %v442_v2 = vmov (%p155_p8), %v208_v24  }
 0x12c PF: >>> { %s147_s24 = sadd.s32 1, %s431_s24   ;;  %v567_v1 = vmov %v443_v2  ;;  %v443_v2 = vphi %v441_v2, %v442_v2  }
 0x12d   : >>> { %p146_p9 = scmp.ge.s32.totalorder %s147_s24, %s570_s11 }
 0x12e   : >> { %v568_v0 = vmov (%p146_p9), %v443_v2 }
 0x12f   : >> { %149 = sbr.rel (!%p146_p9) target bundleno = 30 (0x1e), region = 90 }
 0x136 PF: >> { %s305_s25 = sshll.u32 %s423_s19, 3  ;;  %vm211_vm0 = vcmask 64512   ;;  %s136_s19 = sadd.s32 1, %s423_s19   ;;  %v447_v0 = vphi %v507_v0, %v568_v0  }
 0x137   : >> { %s210_s26 = scalar_lea.vmem %s484_s18, %s305_s25  ;;  %p133_p10 = scmp.ge.s32.totalorder %s136_s19, 8  }
 0x138   : >> { %212 = vst.msk [vmem:[%s210_s26] sm:$0xff] %vm211_vm0, %v447_v0 }
 0x139   : > { %135 = sbr.rel (!%p133_p10) target bundleno = 17 (0x11), region = 101 }
 0x140 PF: > { %s12_s9 = sadd.s32 1, %s419_s9  }
 0x141   : > { %p9_p11 = scmp.ge.s32.totalorder %s12_s9, 10  }
 0x143   :  { %11 = sbr.rel (!%p9_p11) target bundleno = 1 (0x1), region = 112 }

</bundles_post_ra>
